<compile_context>
chip_gen: v5e
topology: v5e:2x2
jax: 0.10.0
libtpu: 0.0.40
codegen_flags: <defaults>
</compile_context>

<pallas_src>
import functools

import jax
import jax.numpy as jnp
from jax.experimental import pallas as pl
from jax.experimental.pallas import tpu as pltpu

MATMUL_DTYPE = jnp.bfloat16   # MXU-native input dtype on v5e / v6e / v7x


# ---------------- Pallas kernels ----------------

def _upconv_kernel(x_ref, w_ref, b_ref, o_ref):
    # x_ref: (TM, Ci)  w_ref: (Ci, 4*Co)  b_ref: (1, 4*Co) f32  o_ref: (TM, 4*Co)
    y = jnp.dot(x_ref[...], w_ref[...], preferred_element_type=jnp.float32) + b_ref[...]
    o_ref[...] = y.astype(o_ref.dtype)


def _conv_bn_relu_kernel(up_ref, skip_ref, w_ref, gamma_ref, beta_ref, mask_ref,
                         out_ref,
                         cat_sc, y_sc, sum_sc, ssq_sc,
                         *, H2, W2, Wp, HoWp, Co, Cs, n_batch, inv_count, eps):
    # up_ref:   (1, 2H, 2W, Co)  bf16    skip_ref: (1, 2H, 2W, Cs) bf16
    # w_ref:    (9, Cc, Co)      bf16    gamma/beta: (1, Co) f32
    # mask_ref: (HoWp, 1) f32  (1.0 on valid columns of the flattened padded rows)
    # out_ref:  (N, HoWp, Co) f32 (resident across the whole batch grid)
    n = pl.program_id(0)

    @pl.when(n == 0)
    def _():
        sum_sc[...] = jnp.zeros_like(sum_sc)
        ssq_sc[...] = jnp.zeros_like(ssq_sc)
        cat_sc[...] = jnp.zeros_like(cat_sc)   # zero padding rows/cols written once

    # ---- stage concat([up, skip]) into the zero-padded, row-flattened VMEM buffer ----
    # flat row p of cat_sc == padded-image pixel (y, x) = (p // Wp, p % Wp), lanes = channels.
    for y2 in range(H2):                               # static unroll over image rows
        r0 = (y2 + 2) * Wp + 2                         # pad = 2 zero rows / cols
        cat_sc[r0:r0 + W2, 0:Co] = up_ref[0, y2].astype(jnp.float32)
        cat_sc[r0:r0 + W2, Co:Co + Cs] = skip_ref[0, y2].astype(jnp.float32)

    # ---- 3x3 conv (padding=2) as 9 shifted matmuls, f32 accumulation on the MXU ----
    # output flat row p covers padded position (p // Wp, p % Wp); the last Wp-Wo columns of
    # each row are wrap-around garbage and are excluded from BN stats via mask_ref.
    acc = jnp.zeros((HoWp, Co), jnp.float32)
    for t in range(9):                                  # static unroll over taps
        dy, dx = t // 3, t % 3
        off = dy * Wp + dx
        lhs = cat_sc[off:off + HoWp, :].astype(MATMUL_DTYPE)
        acc = acc + jnp.dot(lhs, w_ref[t], preferred_element_type=jnp.float32)
    # NOTE: conv bias intentionally dropped -- training-mode BN subtracts the batch
    # mean, which contains the bias, so it cancels exactly in the output.

    # ---- training-mode BatchNorm statistics (carried across the sequential batch grid) ----
    m = mask_ref[...]                                   # (HoWp, 1)
    sum_sc[...] += jnp.sum(acc * m, axis=0, keepdims=True)
    ssq_sc[...] += jnp.sum(acc * acc * m, axis=0, keepdims=True)
    y_sc[n] = acc                                       # conv outputs stay resident in VMEM

    # ---- finalize: fold BN into scale/shift (rsqrt on EUP), apply + ReLU, write once ----
    @pl.when(n == n_batch - 1)
    def _():
        mean = sum_sc[...] * inv_count
        var = ssq_sc[...] * inv_count - mean * mean
        scale = gamma_ref[...] * jax.lax.rsqrt(var + eps)
        shift = beta_ref[...] - mean * scale
        out_ref[...] = jnp.maximum(y_sc[...] * scale + shift, 0.0)


# ---------------- wrapper ----------------

def decoder_block_forward(x_nchw, skip_nchw, params):
    up_w, up_b, conv_w, conv_b, gamma, beta = params
    N, Ci, H, W = x_nchw.shape
    Co = up_w.shape[1]
    Cs = skip_nchw.shape[1]
    Cc = Co + Cs
    assert Cc == conv_w.shape[1]

    H2, W2 = 2 * H, 2 * W
    pad = 2
    Hp, Wp = H2 + 2 * pad, W2 + 2 * pad
    Ho, Wo = Hp - 2, Wp - 2                 # Conv2d k=3: out = in + 2*pad - 2
    HoWp = Ho * Wp
    L = -(-(HoWp + 2 * Wp + 2) // 8) * 8    # flat staging rows (+ slack for tap offsets)

    # ---- ConvTranspose2d(k=2, s=2): batch-folded bf16 matmul (M = N*H*W) ----
    x_flat = (jnp.transpose(x_nchw, (0, 2, 3, 1))
                 .reshape(N * H * W, Ci).astype(MATMUL_DTYPE))
    up_w_mat = (jnp.transpose(up_w, (0, 2, 3, 1))                   # (Ci, kh, kw, Co)
                   .reshape(Ci, 4 * Co).astype(MATMUL_DTYPE))
    up_b_mat = jnp.tile(up_b.astype(jnp.float32), 4).reshape(1, 4 * Co)

    M = N * H * W
    TM = 512 if (M >= 512 and M % 512 == 0) else M                  # row tiles at larger sizes
    y_up = pl.pallas_call(
        _upconv_kernel,
        out_shape=jax.ShapeDtypeStruct((M, 4 * Co), MATMUL_DTYPE),
        grid=(M // TM,),
        in_specs=[
            pl.BlockSpec((TM, Ci), lambda i: (i, 0)),
            pl.BlockSpec((Ci, 4 * Co), lambda i: (0, 0)),
            pl.BlockSpec((1, 4 * Co), lambda i: (0, 0)),
        ],
        out_specs=pl.BlockSpec((TM, 4 * Co), lambda i: (i, 0)),
        compiler_params=pltpu.CompilerParams(dimension_semantics=("parallel",)),
    )(x_flat, up_w_mat, up_b_mat)

    # 2x2 pixel shuffle of the small up tensor (cheap XLA glue pass).
    # TODO(synk): fold this interleave into the conv kernel's staging stores (strided
    #             sublane writes) to drop the remaining HBM round trip of `up`.
    up = (y_up.reshape(N, H, W, 2, 2, Co)
              .transpose(0, 1, 3, 2, 4, 5)
              .reshape(N, H2, W2, Co))

    skip = jnp.transpose(skip_nchw, (0, 2, 3, 1)).astype(MATMUL_DTYPE)   # (N, 2H, 2W, Cs)

    # conv weight per tap: OIHW -> (kh, kw, ci, co) -> (9, Cc, Co); conv bias dropped (BN).
    w_taps = (jnp.transpose(conv_w, (2, 3, 1, 0))
                 .reshape(9, Cc, Co).astype(MATMUL_DTYPE))
    gamma2 = gamma.reshape(1, Co).astype(jnp.float32)
    beta2 = beta.reshape(1, Co).astype(jnp.float32)
    del conv_b  # cancels under training-mode BatchNorm

    # validity mask for flattened padded rows (last Wp-Wo columns per row are garbage)
    col = jnp.arange(HoWp, dtype=jnp.int32) % Wp
    mask = (col < Wo).astype(jnp.float32).reshape(HoWp, 1)

    count = N * Ho * Wo
    kern = functools.partial(
        _conv_bn_relu_kernel, H2=H2, W2=W2, Wp=Wp, HoWp=HoWp, Co=Co, Cs=Cs,
        n_batch=N, inv_count=1.0 / float(count), eps=1e-5)

    out_flat = pl.pallas_call(
        kern,
        out_shape=jax.ShapeDtypeStruct((N, HoWp, Co), jnp.float32),
        grid=(N,),
        in_specs=[
            pl.BlockSpec((1, H2, W2, Co), lambda n: (n, 0, 0, 0)),
            pl.BlockSpec((1, H2, W2, Cs), lambda n: (n, 0, 0, 0)),
            pl.BlockSpec((9, Cc, Co), lambda n: (0, 0, 0)),
            pl.BlockSpec((1, Co), lambda n: (0, 0)),
            pl.BlockSpec((1, Co), lambda n: (0, 0)),
            pl.BlockSpec((HoWp, 1), lambda n: (0, 0)),
        ],
        out_specs=pl.BlockSpec((N, HoWp, Co), lambda n: (0, 0, 0)),   # resident, written once
        scratch_shapes=[
            pltpu.VMEM((L, Cc), jnp.float32),          # padded flat cat staging
            pltpu.VMEM((N, HoWp, Co), jnp.float32),    # resident conv outputs (whole batch)
            pltpu.VMEM((1, Co), jnp.float32),          # running sum
            pltpu.VMEM((1, Co), jnp.float32),          # running sum of squares
        ],
        # "arbitrary": BN-stat accumulators + resident output are carried across the batch.
        # TODO(synk): per-core partial sums would let this axis be "parallel" on v7x megacore;
        #             at production sizes tile HoWp and stream y through HBM (input_output_aliases).
        compiler_params=pltpu.CompilerParams(dimension_semantics=("arbitrary",)),
    )(up, skip, w_taps, gamma2, beta2, mask)

    out = out_flat.reshape(N, Ho, Wp, Co)[:, :, :Wo, :]   # drop the 2 garbage columns per row
    return jnp.transpose(out, (0, 3, 1, 2))                # back to NCHW


# ---------------- pure-JAX reference (f32, for the sanity check) ----------------

def reference_forward(x_nchw, skip_nchw, params):
    up_w, up_b, conv_w, conv_b, gamma, beta = params
    N, Ci, H, W = x_nchw.shape
    Co = up_w.shape[1]
    y = jnp.einsum('nihw,iokl->nohkwl', x_nchw, up_w,
                   precision=jax.lax.Precision.HIGHEST)
    up = y.reshape(N, Co, 2 * H, 2 * W) + up_b[None, :, None, None]
    cat = jnp.concatenate([up, skip_nchw], axis=1)
    conv = jax.lax.conv_general_dilated(
        cat, conv_w, window_strides=(1, 1), padding=((2, 2), (2, 2)),
        dimension_numbers=('NCHW', 'OIHW', 'NCHW'),
        precision=jax.lax.Precision.HIGHEST) + conv_b[None, :, None, None]
    mean = conv.mean(axis=(0, 2, 3), keepdims=True)
    var = ((conv - mean) ** 2).mean(axis=(0, 2, 3), keepdims=True)
    norm = (conv - mean) / jnp.sqrt(var + 1e-5)
    return jnp.maximum(norm * gamma[None, :, None, None] + beta[None, :, None, None], 0.0)


if __name__ == "__main__":
    in_channels, out_channels = 8, 4
    N, H, W = 2, 8, 8

    key = jax.random.PRNGKey(0)
    k1, k2, k3, k4, k5, k6, kx, ks = jax.random.split(key, 8)
    params = (
        0.1 * jax.random.normal(k1, (in_channels, out_channels, 2, 2), jnp.float32),  # up weight
        0.1 * jax.random.normal(k2, (out_channels,), jnp.float32),                    # up bias
        0.1 * jax.random.normal(k3, (out_channels, in_channels, 3, 3), jnp.float32),  # conv weight
        0.1 * jax.random.normal(k4, (out_channels,), jnp.float32),                    # conv bias
        1.0 + 0.1 * jax.random.normal(k5, (out_channels,), jnp.float32),              # bn gamma
        0.1 * jax.random.normal(k6, (out_channels,), jnp.float32),                    # bn beta
    )

    x = jax.random.normal(kx, (N, in_channels, H, W), jnp.float32)                     # NCHW
    skip = jax.random.normal(ks, (N, in_channels - out_channels, 2 * H, 2 * W), jnp.float32)

    out = jax.block_until_ready(decoder_block_forward(x, skip, params))
    ref = reference_forward(x, skip, params)

    assert out.shape == (N, out_channels, 2 * H + 2, 2 * W + 2), out.shape
    max_err = float(jnp.abs(out - ref).max())
    # bf16 MXU operands vs f32 reference -> allow ~2e-2
    assert jnp.allclose(out, ref, rtol=2e-2, atol=2e-2), max_err
    print("KERNEL_OK")
</pallas_src>

<mosaic_0001>
module attributes {stable_mosaic.version = 11 : i64} {
  func.func @_upconv_kernel(%arg0: i32, %arg1: memref<128x8xbf16, #tpu.memory_space<vmem>>, %arg2: memref<8x16xbf16, #tpu.memory_space<vmem>>, %arg3: memref<1x16xf32, #tpu.memory_space<vmem>>, %arg4: memref<128x16xbf16, #tpu.memory_space<vmem>>) attributes {dimension_semantics = [#tpu.dimension_semantics<parallel>], iteration_bounds = array<i64: 1>, scalar_prefetch = 0 : i64, scratch_operands = 0 : i64, tpu.core_type = #tpu.core_type<tc>, window_params = [{transform_indices = @transform_0, window_bounds = array<i64: 128, 8>}, {pipeline_mode = #tpu.pipeline_mode<synchronous>, transform_indices = @transform_1, window_bounds = array<i64: 8, 16>}, {pipeline_mode = #tpu.pipeline_mode<synchronous>, transform_indices = @transform_2, window_bounds = array<i64: 1, 16>}, {transform_indices = @transform_3, window_bounds = array<i64: 128, 16>}]} {
    %c0 = arith.constant 0 : index
    %c0_0 = arith.constant 0 : index
    %0 = vector.load %arg1[%c0, %c0_0] : memref<128x8xbf16, #tpu.memory_space<vmem>>, vector<128x8xbf16>
    %c0_1 = arith.constant 0 : index
    %c0_2 = arith.constant 0 : index
    %1 = vector.load %arg2[%c0_1, %c0_2] : memref<8x16xbf16, #tpu.memory_space<vmem>>, vector<8x16xbf16>
    %cst = arith.constant dense<0.000000e+00> : vector<128x16xf32>
    %2 = tpu.matmul %0, %1, %cst {dimension_numbers = #tpu.dot_dimension_numbers<[1], [0], [0], [1], [0, 0, 1, 1], [], []>} : vector<128x8xbf16>, vector<8x16xbf16>, vector<128x16xf32> -> vector<128x16xf32>
    %c0_3 = arith.constant 0 : index
    %c0_4 = arith.constant 0 : index
    %3 = vector.load %arg3[%c0_3, %c0_4] : memref<1x16xf32, #tpu.memory_space<vmem>>, vector<1x16xf32>
    %4 = vector.broadcast %3 : vector<1x16xf32> to vector<128x16xf32>
    %5 = arith.addf %2, %4 : vector<128x16xf32>
    %6 = arith.truncf %5 : vector<128x16xf32> to vector<128x16xbf16>
    %c0_5 = arith.constant 0 : index
    %c0_6 = arith.constant 0 : index
    %7 = vector.load %arg4[%c0_5, %c0_6] : memref<128x16xbf16, #tpu.memory_space<vmem>>, vector<128x16xbf16>
    tpu.vector_store %arg4[%c0_5, %c0_6], %6 {strides = array<i32>} : memref<128x16xbf16, #tpu.memory_space<vmem>>, vector<128x16xbf16>,
    return
  }
  func.func @transform_0(%arg0: i32) -> (i32, i32) {
    %c0_i32 = arith.constant 0 : i32
    %c0_i32_0 = arith.constant 0 : i32
    return %arg0, %c0_i32 : i32, i32
  }
  func.func @transform_1(%arg0: i32) -> (i32, i32) {
    %c0_i32 = arith.constant 0 : i32
    %c0_i32_0 = arith.constant 0 : i32
    %c0_i32_1 = arith.constant 0 : i32
    return %c0_i32, %c0_i32_0 : i32, i32
  }
  func.func @transform_2(%arg0: i32) -> (i32, i32) {
    %c0_i32 = arith.constant 0 : i32
    %c0_i32_0 = arith.constant 0 : i32
    %c0_i32_1 = arith.constant 0 : i32
    return %c0_i32, %c0_i32_0 : i32, i32
  }
  func.func @transform_3(%arg0: i32) -> (i32, i32) {
    %c0_i32 = arith.constant 0 : i32
    %c0_i32_0 = arith.constant 0 : i32
    return %arg0, %c0_i32 : i32, i32
  }
}

</mosaic_0001>

<bundles_post_ra>
// kernel: tpu_custom_call.1
= control target key start
LH: loop header
LB: loop body
LE: loop exit
PB: predicated region body
PF: predicated region fallthrough
CT: control target
= control target key end

     0   :  { %vm101_vm0 = vcmask 1043456   ;;  %vm76_vm1 = vcmask 64512   ;;  %vm170_vm2 = vcmask 125952   ;;  %s365_s1 = inlined_call_operand.vmem [shape: bf16[8,16], index: 1, kind: input, shape index: {}]   ;;  %s366_s0 = inlined_call_operand.vmem [shape: bf16[128,8], index: 0, kind: input, shape index: {}]   ;;  %s367_s2 = inlined_call_operand.vmem [shape: f32[1,16], index: 2, kind: input, shape index: {}]   ;;  %s368_s3 = inlined_call_operand.vmem [shape: bf16[128,16], index: 3, kind: output, shape index: {}]  }
   0x1   :  { %v31_v0 = vld [vmem:[%s365_s1] sm:$0xf]  ;;  %v233_v3 = vld [vmem:[%s366_s0 + $0x10] sm:$0xff]  ;;  %v232_v6 = vld [vmem:[%s366_s0 + $0x8] sm:$0xff] }
   0x2   :  { %v103_v1 = vsel %vm101_vm0, %v31_v0, 0  ;;  %v231_v2 = vld [vmem:[%s366_s0] sm:$0xff]  ;;  %v237_v5 = vld [vmem:[%s366_s0 + $0x30] sm:$0xff]  ;;  %v234_v7 = vld [vmem:[%s366_s0 + $0x18] sm:$0xff] }
   0x3   :  { %112 = vmatpush.bf16.msra.mxu0 %v103_v1  ;;  %239 = vmatpush.bf16.msra.mxu1 %v103_v1  ;;  %v235_v4 = vld [vmem:[%s366_s0 + $0x20] sm:$0xff]  ;;  %v236_v8 = vld [vmem:[%s366_s0 + $0x28] sm:$0xff]  ;;  %v238_v9 = vld [vmem:[%s366_s0 + $0x38] sm:$0xff] }
   0x4   :  { %240 = vmatpush.bf16.msra.mxu2 %v103_v1  ;;  %241 = vmatpush.bf16.msra.mxu3 %v103_v1  ;;  %v242_v10 = vld [vmem:[%s367_s2] ss:$0 sm:$0xff] }
   0x6   :  { %223 = vmatmul.msk.bf16.vlgmr.msra.gmra.mxu0 %vm76_vm1, %v231_v2  ;;  %225 = vmatmul.msk.bf16.vlgmr.msra.gmra.mxu1 %vm76_vm1, %v233_v3 }
   0x7   :  { %227 = vmatmul.msk.bf16.vlgmr.msra.gmra.mxu2 %vm76_vm1, %v235_v4  ;;  %229 = vmatmul.msk.bf16.vlgmr.msra.gmra.mxu3 %vm76_vm1, %v237_v5 }
  0x16   :  { %224 = vmatmul.msk.bf16.gmra.mxu0 %vm76_vm1, %v232_v6  ;;  %226 = vmatmul.msk.bf16.gmra.mxu1 %vm76_vm1, %v234_v7 }
  0x17   :  { %228 = vmatmul.msk.bf16.gmra.mxu2 %vm76_vm1, %v236_v8  ;;  %230 = vmatmul.msk.bf16.gmra.mxu3 %vm76_vm1, %v238_v9 }
  0x83   :  { %v114_v11 = vpop.f32.mrf.mxu0  ;;  %v124_v12 = vpop.f32.mrf.mxu1 }
  0x84   :  { %v115_v13 = vadd.f32 %v242_v10, %v114_v11  ;;  %v125_v14 = vadd.f32 %v242_v10, %v124_v12 }
  0x86   :  { %v154_v15 = vpack.c.bf16 %v115_v13, %v115_v13  ;;  %v158_v16 = vpack.c.bf16 %v125_v14, %v125_v14 }
  0x88   :  { %171 = vst.msk [vmem:[%s368_s3] sm:$0xf] %vm170_vm2, %v154_v15 }
  0x89   :  { %175 = vst.msk [vmem:[%s368_s3 + $0x10] sm:$0xf] %vm170_vm2, %v158_v16 }
  0x8a   :  { %v134_v17 = vpop.f32.mrf.mxu2  ;;  %v144_v18 = vpop.f32.mrf.mxu3 }
  0x8b   :  { %v135_v19 = vadd.f32 %v242_v10, %v134_v17  ;;  %v145_v20 = vadd.f32 %v242_v10, %v144_v18  ;;  %v116_v21 = vpop.f32.mrf.mxu0  ;;  %v126_v22 = vpop.f32.mrf.mxu1 }
  0x8c   :  { %v117_v23 = vadd.f32 %v242_v10, %v116_v21  ;;  %v127_v24 = vadd.f32 %v242_v10, %v126_v22 }
  0x8d   :  { %v162_v25 = vpack.c.bf16 %v135_v19, %v135_v19  ;;  %v166_v26 = vpack.c.bf16 %v145_v20, %v145_v20 }
  0x8e   :  { %v155_v27 = vpack.c.bf16 %v117_v23, %v117_v23  ;;  %v159_v28 = vpack.c.bf16 %v127_v24, %v127_v24 }
  0x8f   :  { %179 = vst.msk [vmem:[%s368_s3 + $0x20] sm:$0xf] %vm170_vm2, %v162_v25 }
  0x90   :  { %183 = vst.msk [vmem:[%s368_s3 + $0x30] sm:$0xf] %vm170_vm2, %v166_v26 }
  0x91   :  { %172 = vst.msk [vmem:[%s368_s3 + $0x4] sm:$0xf] %vm170_vm2, %v155_v27 }
  0x92   :  { %176 = vst.msk [vmem:[%s368_s3 + $0x14] sm:$0xf] %vm170_vm2, %v159_v28  ;;  %v136_v29 = vpop.f32.mrf.mxu2  ;;  %v146_v30 = vpop.f32.mrf.mxu3 }
  0x93   :  { %v137_v31 = vadd.f32 %v242_v10, %v136_v29  ;;  %v147_v32 = vadd.f32 %v242_v10, %v146_v30  ;;  %v119_v33 = vpop.f32.mrf.mxu0  ;;  %v129_v34 = vpop.f32.mrf.mxu1 }
  0x94   :  { %v120_v35 = vadd.f32 %v242_v10, %v119_v33  ;;  %v130_v36 = vadd.f32 %v242_v10, %v129_v34 }
  0x95   :  { %v163_v37 = vpack.c.bf16 %v137_v31, %v137_v31  ;;  %v167_v38 = vpack.c.bf16 %v147_v32, %v147_v32 }
  0x96   :  { %v156_v39 = vpack.c.bf16 %v120_v35, %v120_v35  ;;  %v160_v40 = vpack.c.bf16 %v130_v36, %v130_v36 }
  0x97   :  { %180 = vst.msk [vmem:[%s368_s3 + $0x24] sm:$0xf] %vm170_vm2, %v163_v37 }
  0x98   :  { %184 = vst.msk [vmem:[%s368_s3 + $0x34] sm:$0xf] %vm170_vm2, %v167_v38 }
  0x99   :  { %173 = vst.msk [vmem:[%s368_s3 + $0x8] sm:$0xf] %vm170_vm2, %v156_v39 }
  0x9a   :  { %177 = vst.msk [vmem:[%s368_s3 + $0x18] sm:$0xf] %vm170_vm2, %v160_v40  ;;  %v139_v41 = vpop.f32.mrf.mxu2  ;;  %v149_v42 = vpop.f32.mrf.mxu3 }
  0x9b   :  { %v140_v43 = vadd.f32 %v242_v10, %v139_v41  ;;  %v150_v44 = vadd.f32 %v242_v10, %v149_v42  ;;  %v121_v45 = vpop.f32.mrf.mxu0  ;;  %v131_v46 = vpop.f32.mrf.mxu1 }
  0x9c   :  { %v122_v47 = vadd.f32 %v242_v10, %v121_v45  ;;  %v132_v48 = vadd.f32 %v242_v10, %v131_v46 }
  0x9d   :  { %v164_v49 = vpack.c.bf16 %v140_v43, %v140_v43  ;;  %v168_v50 = vpack.c.bf16 %v150_v44, %v150_v44 }
  0x9e   :  { %v157_v51 = vpack.c.bf16 %v122_v47, %v122_v47  ;;  %v161_v52 = vpack.c.bf16 %v132_v48, %v132_v48 }
  0x9f   :  { %181 = vst.msk [vmem:[%s368_s3 + $0x28] sm:$0xf] %vm170_vm2, %v164_v49 }
  0xa0   :  { %185 = vst.msk [vmem:[%s368_s3 + $0x38] sm:$0xf] %vm170_vm2, %v168_v50 }
  0xa1   :  { %174 = vst.msk [vmem:[%s368_s3 + $0xc] sm:$0xf] %vm170_vm2, %v157_v51 }
  0xa2   :  { %178 = vst.msk [vmem:[%s368_s3 + $0x1c] sm:$0xf] %vm170_vm2, %v161_v52  ;;  %v141_v53 = vpop.f32.mrf.mxu2  ;;  %v151_v54 = vpop.f32.mrf.mxu3 }
  0xa3   :  { %v142_v55 = vadd.f32 %v242_v10, %v141_v53  ;;  %v152_v56 = vadd.f32 %v242_v10, %v151_v54 }
  0xa5   :  { %v165_v57 = vpack.c.bf16 %v142_v55, %v142_v55  ;;  %v169_v58 = vpack.c.bf16 %v152_v56, %v152_v56 }
  0xa7   :  { %182 = vst.msk [vmem:[%s368_s3 + $0x2c] sm:$0xf] %vm170_vm2, %v165_v57 }
  0xa8   :  { %186 = vst.msk [vmem:[%s368_s3 + $0x3c] sm:$0xf] %vm170_vm2, %v169_v58 }

</bundles_post_ra>
